<compile_context>
chip_gen: v7x
topology: tpu7x:2x2x1
jax: 0.10.0
libtpu: 0.0.40
codegen_flags: <defaults>
</compile_context>

<pallas_src>
import functools

import jax
import jax.numpy as jnp
from jax.experimental import pallas as pl
from jax.experimental.pallas import tpu as pltpu


# ---------------------- shared math (used in-kernel and by the reference) ----------


def _layernorm(v, g, b, eps=1e-5):
    mu = jnp.mean(v, axis=-1, keepdims=True)
    var = jnp.mean(jnp.square(v - mu), axis=-1, keepdims=True)
    return (v - mu) * jax.lax.rsqrt(var + eps) * g + b


def _gelu(v):
    # TODO(synk): PyTorch nn.GELU() defaults to the exact erf form; the tanh
    # approximation (~1e-3 difference) is used here for robust Mosaic lowering.
    c = 0.7978845608028654  # sqrt(2/pi)
    return 0.5 * v * (1.0 + jnp.tanh(c * (v + 0.044715 * v * v * v)))


# ---------------------- kernels -----------------------------------------------------


def _embed_kernel(tok_ref, table_ref, pos_ref, o_ref):
    """Token embedding as one-hot @ table on the MXU (exact in f32) + positional emb.

    tok_ref:   (N, 1) int32   flattened (batch*seq) token ids
    table_ref: (V, D) f32     token embedding table
    pos_ref:   (N, D) f32     positional embedding, tiled per batch
    o_ref:     (N, D)
    """
    tok = tok_ref[...]
    n = tok.shape[0]
    v = table_ref.shape[0]
    onehot = (jax.lax.broadcasted_iota(jnp.int32, (n, v), 1) == tok).astype(jnp.float32)
    emb = jnp.dot(onehot, table_ref[...].astype(jnp.float32),
                  preferred_element_type=jnp.float32)
    o_ref[...] = (emb + pos_ref[...].astype(jnp.float32)).astype(o_ref.dtype)


def _encoder_layer_kernel(x_ref, wqkv_ref, wo_ref, bo_ref, ln_ref,
                          w1_ref, b1_ref, w2_ref, b2_ref, lnf_ref,
                          o_ref, h_ref, *, heads, dim_head):
    """One (batch, layer) grid step of the pre-norm encoder stack.

    x_ref   : (S, D)        embedded input for this batch element
    wqkv_ref: (D, 3*inner)  fused Q/K/V projection for this layer
    wo_ref  : (inner, D)    attention output projection
    bo_ref  : (1, D)
    ln_ref  : (4, D)        [gamma1, beta1, gamma2, beta2]
    w1_ref  : (D, F), b1_ref: (1, F), w2_ref: (F, D), b2_ref: (1, D)   MLP
    lnf_ref : (2, D)        final LayerNorm [gamma, beta]
    o_ref   : (S, D)        output (written at the last layer only)
    h_ref   : (S, D) f32    VMEM scratch: residual stream, persists across layers
    """
    l = pl.program_id(1)
    inner = heads * dim_head
    scale = dim_head ** -0.5

    @pl.when(l == 0)
    def _():
        h_ref[...] = x_ref[...].astype(jnp.float32)

    x = h_ref[...]                                   # (S, D) residual stream
    ln = ln_ref[...].astype(jnp.float32)             # (4, D)

    # ---- attention sub-layer: x = x + Wo @ Attn(LN(x)) ----
    xn = _layernorm(x, ln[0:1, :], ln[1:2, :])
    qkv = jnp.dot(xn, wqkv_ref[...].astype(jnp.float32),
                  preferred_element_type=jnp.float32)        # (S, 3*inner)

    head_outs = []
    for hd in range(heads):
        q = qkv[:, hd * dim_head:(hd + 1) * dim_head]
        k = qkv[:, inner + hd * dim_head:inner + (hd + 1) * dim_head]
        v = qkv[:, 2 * inner + hd * dim_head:2 * inner + (hd + 1) * dim_head]
        s = jax.lax.dot_general(q, k, (((1,), (1,)), ((), ())),
                                preferred_element_type=jnp.float32) * scale  # (S, S)
        s = s - jnp.max(s, axis=-1, keepdims=True)
        p = jnp.exp(s)
        p = p / jnp.sum(p, axis=-1, keepdims=True)
        head_outs.append(jnp.dot(p, v, preferred_element_type=jnp.float32))  # (S, dh)
    attn = jnp.concatenate(head_outs, axis=1)                               # (S, inner)
    attn = jnp.dot(attn, wo_ref[...].astype(jnp.float32),
                   preferred_element_type=jnp.float32) + bo_ref[...].astype(jnp.float32)
    x = x + attn

    # ---- feed-forward sub-layer: x = x + W2 @ GELU(W1 @ LN(x)) ----
    xn2 = _layernorm(x, ln[2:3, :], ln[3:4, :])
    hmid = jnp.dot(xn2, w1_ref[...].astype(jnp.float32),
                   preferred_element_type=jnp.float32) + b1_ref[...].astype(jnp.float32)
    hmid = _gelu(hmid)
    ff = jnp.dot(hmid, w2_ref[...].astype(jnp.float32),
                 preferred_element_type=jnp.float32) + b2_ref[...].astype(jnp.float32)
    x = x + ff

    h_ref[...] = x

    @pl.when(l == pl.num_programs(1) - 1)
    def _():
        lnf = lnf_ref[...].astype(jnp.float32)
        o_ref[...] = _layernorm(x, lnf[0:1, :], lnf[1:2, :]).astype(o_ref.dtype)


# ---------------------- pallas_call wrappers ----------------------------------------


def _embed_pallas(tok_flat, table, pos_tiled):
    n = tok_flat.shape[0]
    d = table.shape[1]
    return pl.pallas_call(
        _embed_kernel,
        out_shape=jax.ShapeDtypeStruct((n, d), table.dtype),
    )(tok_flat, table, pos_tiled)


def _encoder_pallas(x_emb, wqkv, wo, bo, ln, w1, b1, w2, b2, lnf, *, heads, dim_head):
    B, S, D = x_emb.shape
    L = wqkv.shape[0]
    inner = heads * dim_head
    F = w1.shape[2]
    kernel = functools.partial(_encoder_layer_kernel, heads=heads, dim_head=dim_head)
    return pl.pallas_call(
        kernel,
        out_shape=jax.ShapeDtypeStruct((B, S, D), x_emb.dtype),
        grid=(B, L),
        in_specs=[
            pl.BlockSpec((None, S, D), lambda b, l: (b, 0, 0)),          # x (per batch)
            pl.BlockSpec((None, D, 3 * inner), lambda b, l: (l, 0, 0)),  # Wqkv (per layer)
            pl.BlockSpec((None, inner, D), lambda b, l: (l, 0, 0)),      # Wo
            pl.BlockSpec((None, 1, D), lambda b, l: (l, 0, 0)),          # bo
            pl.BlockSpec((None, 4, D), lambda b, l: (l, 0, 0)),          # ln params
            pl.BlockSpec((None, D, F), lambda b, l: (l, 0, 0)),          # W1
            pl.BlockSpec((None, 1, F), lambda b, l: (l, 0, 0)),          # b1
            pl.BlockSpec((None, F, D), lambda b, l: (l, 0, 0)),          # W2
            pl.BlockSpec((None, 1, D), lambda b, l: (l, 0, 0)),          # b2
            pl.BlockSpec((2, D), lambda b, l: (0, 0)),                   # final LN
        ],
        out_specs=pl.BlockSpec((None, S, D), lambda b, l: (b, 0, 0)),
        scratch_shapes=[pltpu.VMEM((S, D), jnp.float32)],
        compiler_params=pltpu.CompilerParams(
            dimension_semantics=("parallel", "arbitrary")),
    )(x_emb, wqkv, wo, bo, ln, w1, b1, w2, b2, lnf)


# ---------------------- module -------------------------------------------------------


class AbstractEncoder:
    def encode(self, *args, **kwargs):
        raise NotImplementedError


class TransformerEmbedder(AbstractEncoder):
    """Some transformer encoder layers (returns embeddings)."""

    def __init__(self, n_embed, n_layer, vocab_size, max_seq_len=77,
                 heads=8, dim_head=64, ff_mult=4, *, key=None):
        self.n_embed = n_embed
        self.n_layer = n_layer
        self.vocab_size = vocab_size
        self.max_seq_len = max_seq_len
        self.heads = heads
        self.dim_head = dim_head
        D, L = n_embed, n_layer
        inner = heads * dim_head
        F = ff_mult * n_embed

        if key is None:
            key = jax.random.PRNGKey(0)
        ks = jax.random.split(key, 12)
        nrm = lambda k, shp, s=0.02: s * jax.random.normal(k, shp, dtype=jnp.float32)

        self.token_emb = nrm(ks[0], (vocab_size, D))
        self.pos_emb = nrm(ks[1], (max_seq_len, D))
        self.wqkv = nrm(ks[2], (L, D, 3 * inner))
        self.wo = nrm(ks[3], (L, inner, D))
        self.bo = nrm(ks[4], (L, 1, D))
        # per-layer LayerNorm params, rows = [gamma1, beta1, gamma2, beta2]
        gammas = 1.0 + nrm(ks[5], (L, 2, D), 0.1)
        betas = nrm(ks[6], (L, 2, D), 0.1)
        self.ln = jnp.stack([gammas[:, 0], betas[:, 0], gammas[:, 1], betas[:, 1]], axis=1)
        self.w1 = nrm(ks[7], (L, D, F))
        self.b1 = nrm(ks[8], (L, 1, F))
        self.w2 = nrm(ks[9], (L, F, D))
        self.b2 = nrm(ks[10], (L, 1, D))
        gf = 1.0 + 0.1 * jax.random.normal(ks[11], (2, D), dtype=jnp.float32)
        self.lnf = jnp.stack([gf[0], 0.1 * gf[1] - 0.1], axis=0)  # (2, D): [gamma, beta]

    def __call__(self, tokens):               # tokens: (B, S) int
        B, S = tokens.shape
        D = self.n_embed
        tok_flat = tokens.reshape(B * S, 1).astype(jnp.int32)
        pos_tiled = jnp.tile(self.pos_emb[:S], (B, 1))       # (B*S, D) glue
        emb = _embed_pallas(tok_flat, self.token_emb, pos_tiled)
        x = emb.reshape(B, S, D)
        z = _encoder_pallas(x, self.wqkv, self.wo, self.bo, self.ln,
                            self.w1, self.b1, self.w2, self.b2, self.lnf,
                            heads=self.heads, dim_head=self.dim_head)
        return z

    def encode(self, x):
        return self(x)


# ---------------------- pure-JAX reference & test ------------------------------------


def _reference_forward(tokens, m):
    B, S = tokens.shape
    H, DH = m.heads, m.dim_head
    inner = H * DH
    x = m.token_emb[tokens] + m.pos_emb[:S][None, :, :]
    for l in range(m.n_layer):
        g1, be1, g2, be2 = m.ln[l, 0], m.ln[l, 1], m.ln[l, 2], m.ln[l, 3]
        xn = _layernorm(x, g1, be1)
        qkv = xn @ m.wqkv[l]
        q = qkv[..., :inner].reshape(B, S, H, DH)
        k = qkv[..., inner:2 * inner].reshape(B, S, H, DH)
        v = qkv[..., 2 * inner:].reshape(B, S, H, DH)
        s = jnp.einsum('bihd,bjhd->bhij', q, k) * (DH ** -0.5)
        p = jax.nn.softmax(s, axis=-1)
        o = jnp.einsum('bhij,bjhd->bihd', p, v).reshape(B, S, inner)
        x = x + o @ m.wo[l] + m.bo[l, 0]
        xn2 = _layernorm(x, g2, be2)
        hmid = _gelu(xn2 @ m.w1[l] + m.b1[l, 0])
        x = x + hmid @ m.w2[l] + m.b2[l, 0]
    return _layernorm(x, m.lnf[0], m.lnf[1])


if __name__ == "__main__":
    key = jax.random.PRNGKey(0)
    kparam, ktok = jax.random.split(key)

    B, S = 2, 8
    n_embed, n_layer, vocab_size, max_seq_len = 32, 2, 128, 16

    model = TransformerEmbedder(n_embed=n_embed, n_layer=n_layer,
                                vocab_size=vocab_size, max_seq_len=max_seq_len,
                                key=kparam)
    tokens = jax.random.randint(ktok, (B, S), 0, vocab_size)

    z = jax.block_until_ready(model(tokens))
    assert z.shape == (B, S, n_embed), z.shape

    ref = _reference_forward(tokens, model)
    err = float(jnp.max(jnp.abs(z - ref)))
    assert jnp.allclose(z, ref, atol=1e-3, rtol=1e-3), err

    print("KERNEL_OK")
</pallas_src>

<mosaic_0001>
module attributes {stable_mosaic.version = 11 : i64} {
  func.func @_embed_kernel(%arg0: memref<16x1xi32, #tpu.memory_space<vmem>>, %arg1: memref<128x32xf32, #tpu.memory_space<vmem>>, %arg2: memref<16x32xf32, #tpu.memory_space<vmem>>, %arg3: memref<16x32xf32, #tpu.memory_space<vmem>>) attributes {dimension_semantics = [], scalar_prefetch = 0 : i64, scratch_operands = 0 : i64, tpu.core_type = #tpu.core_type<tc>} {
    %c0 = arith.constant 0 : index
    %c0_0 = arith.constant 0 : index
    %0 = vector.load %arg0[%c0, %c0_0] : memref<16x1xi32, #tpu.memory_space<vmem>>, vector<16x1xi32>
    %1 = tpu.iota {dimensions = array<i32: 1>} : vector<16x128xi32>
    %2 = vector.broadcast %0 : vector<16x1xi32> to vector<16x128xi32>
    %3 = arith.cmpi eq, %1, %2 : vector<16x128xi32>
    %4 = arith.extui %3 : vector<16x128xi1> to vector<16x128xi32>
    %5 = arith.sitofp %4 : vector<16x128xi32> to vector<16x128xf32>
    %c0_1 = arith.constant 0 : index
    %c0_2 = arith.constant 0 : index
    %6 = vector.load %arg1[%c0_1, %c0_2] : memref<128x32xf32, #tpu.memory_space<vmem>>, vector<128x32xf32>
    %cst = arith.constant dense<0.000000e+00> : vector<16x32xf32>
    %7 = tpu.matmul %5, %6, %cst {dimension_numbers = #tpu.dot_dimension_numbers<[1], [0], [0], [1], [0, 0, 1, 1], [], []>} : vector<16x128xf32>, vector<128x32xf32>, vector<16x32xf32> -> vector<16x32xf32>
    %c0_3 = arith.constant 0 : index
    %c0_4 = arith.constant 0 : index
    %8 = vector.load %arg2[%c0_3, %c0_4] : memref<16x32xf32, #tpu.memory_space<vmem>>, vector<16x32xf32>
    %9 = arith.addf %7, %8 : vector<16x32xf32>
    %c0_5 = arith.constant 0 : index
    %c0_6 = arith.constant 0 : index
    %10 = vector.load %arg3[%c0_5, %c0_6] : memref<16x32xf32, #tpu.memory_space<vmem>>, vector<16x32xf32>
    tpu.vector_store %arg3[%c0_5, %c0_6], %9 {strides = array<i32>} : memref<16x32xf32, #tpu.memory_space<vmem>>, vector<16x32xf32>,
    return
  }
}

</mosaic_0001>

<bundles_post_ra>
// kernel: tpu_custom_call.1
= control target key start
LH: loop header
LB: loop body
LE: loop exit
PB: predicated region body
PF: predicated region fallthrough
CT: control target
= control target key end

     0   :  { %v262_v2 = vmov 0   ;;  %s359_s0 = inlined_call_operand.vmem [shape: s32[16,1], index: 0, kind: input, shape index: {}]   ;;  %s360_s1 = inlined_call_operand.vmem [shape: f32[128,32], index: 1, kind: input, shape index: {}]   ;;  %s361_s2 = inlined_call_operand.vmem [shape: f32[16,32], index: 2, kind: input, shape index: {}]   ;;  %s362_s3 = inlined_call_operand.hbm [shape: f32[16,32], index: 3, kind: output, shape index: {}]  }
   0x1   :  { %v15_v0 = vld [vmem:[%s359_s0] sm:$0xff]  ;;  %237 = vset.pattern.permute.xlu0 %v262_v2  ;;  %v32_v3 = vld [vmem:[%s360_s1 + $0x8] sm:$0xff]  ;;  %v33_v4 = vld [vmem:[%s360_s1 + $0x10] sm:$0xff] }
   0x2   :  { %v31_v1 = vld [vmem:[%s360_s1] sm:$0xff]  ;;  %v34_v5 = vld [vmem:[%s360_s1 + $0x18] sm:$0xff]  ;;  %20 = vperm.xlu0 %237, %v15_v0   ;;  %v16_v8 = vld [vmem:[%s359_s0 + $0x8] sm:$0xff] }
   0x3   :  { %v200_v6 = vpack.c.bf16 %v32_v3, %v31_v1  ;;  %v204_v7 = vpack.c.bf16 %v34_v5, %v33_v4  ;;  %v35_v9 = vld [vmem:[%s360_s1 + $0x20] sm:$0xff]  ;;  %v36_v10 = vld [vmem:[%s360_s1 + $0x28] sm:$0xff] }
   0x4   :  { %v208_v11 = vpack.c.bf16 %v36_v10, %v35_v9 }
   0x5   :  { %201 = vmatprep.subr.bf16.mxu0 %v200_v6 }
   0x6   :  { %203 = vmatpush3.bf16.msra.mxu0 %v200_v6  ;;  %23 = vperm.xlu0 %237, %v16_v8  }
   0x7   :  { %205 = vmatprep.subr.bf16.mxu0 %v204_v7 }
   0x8   :  { %8 = vsyncpa [#allocation3], 0  ;;  %v37_v12 = vld [vmem:[%s360_s1 + $0x30] sm:$0xff]  ;;  %v38_v13 = vld [vmem:[%s360_s1 + $0x38] sm:$0xff]  ;;  %v17_v27 = vlaneseq  ;;  %v263_v30 = vmov 1.0   ;;  %vm124_vm2 = vcmask 261120  }
   0x9   :  { %v212_v14 = vpack.c.bf16 %v38_v13, %v37_v12  ;;  %v39_v15 = vld [vmem:[%s360_s1 + $0x40] sm:$0xff]  ;;  %v40_v16 = vld [vmem:[%s360_s1 + $0x48] sm:$0xff]  ;;  %v41_v18 = vld [vmem:[%s360_s1 + $0x50] sm:$0xff] }
   0xa   :  { %207 = vmatpush3.bf16.msra.mxu0 %v204_v7  ;;  %v216_v17 = vpack.c.bf16 %v40_v16, %v39_v15  ;;  %v42_v19 = vld [vmem:[%s360_s1 + $0x58] sm:$0xff]  ;;  %v43_v21 = vld [vmem:[%s360_s1 + $0x60] sm:$0xff]  ;;  %v44_v22 = vld [vmem:[%s360_s1 + $0x68] sm:$0xff]  ;;  %v18_v28 = vand.u32 127, %v17_v27 }
   0xb   :  { %209 = vmatprep.subr.bf16.mxu0 %v208_v11  ;;  %v220_v20 = vpack.c.bf16 %v42_v19, %v41_v18  ;;  %v224_v23 = vpack.c.bf16 %v44_v22, %v43_v21  ;;  %v45_v24 = vld [vmem:[%s360_s1 + $0x70] sm:$0xff]  ;;  %v46_v25 = vld [vmem:[%s360_s1 + $0x78] sm:$0xff]  ;;  %v48_v32 = vld [vmem:[%s361_s2 + $0x8] sm:$0xff]  ;;  %s264_s1 = smov [#allocation2]  }
   0xc   :  { %v228_v26 = vpack.c.bf16 %v46_v25, %v45_v24  ;;  %s132_s22 = sshll.u32 %s264_s1, 4  ;;  %v47_v33 = vld [vmem:[%s361_s2] sm:$0xff]  ;;  %s133_s22 = int_to_ptr.vmem [resolvable:$true] %s132_s22 }
   0xd   :  { %s238_s25 = scalar_lea.vmem %s133_s22, 256  ;;  %p243_p1 = scmp.lt.s32.totalorder %s133_s22, %s133_s22 }
   0xe   :  { %211 = vmatpush3.bf16.msra.mxu0 %v208_v11  ;;  %p239_p0 = scmp.ne.s32.totalorder %s133_s22, %s238_s25  ;;  %p244_p2 = scmp.lt.s32.totalorder %s238_s25, %s238_s25 }
   0xf   :  { %213 = vmatprep.subr.bf16.mxu0 %v212_v14 }
  0x10   :  { %p245_p3 = por %p244_p2, %p243_p1 }
  0x12   :  { %215 = vmatpush3.bf16.msra.mxu0 %v212_v14  ;;  %p246_p4 = pnand %p245_p3, %p239_p0 }
  0x13   :  { %217 = vmatprep.subr.bf16.mxu0 %v216_v17 }
  0x16   :  { %219 = vmatpush3.bf16.msra.mxu0 %v216_v17 }
  0x17   :  { %221 = vmatprep.subr.bf16.mxu0 %v220_v20 }
  0x1a   :  { %223 = vmatpush3.bf16.msra.mxu0 %v220_v20 }
  0x1b   :  { %225 = vmatprep.subr.bf16.mxu0 %v224_v23 }
  0x1e   :  { %227 = vmatpush3.bf16.msra.mxu0 %v224_v23 }
  0x1f   :  { %229 = vmatprep.subr.bf16.mxu0 %v228_v26 }
  0x22   :  { %231 = vmatpush3.bf16.msra.mxu0 %v228_v26 }
  0x81   :  { %v21_v29 = vpop.permute.xlu0 %20 }
  0x82   :  { %vm25_vm0 = vcmp.eq.s32.totalorder %v18_v28, %v21_v29 }
  0x83   :  { %197 = vmatprep.mubr.msk.f32.mxu0 %vm25_vm0, %v263_v30 }
  0x85   :  { %v24_v31 = vpop.permute.xlu0 %23 }
  0x86   :  { %vm26_vm1 = vcmp.eq.s32.totalorder %v18_v28, %v24_v31 }
  0x87   :  { %198 = vmatmul.mubr.msk.f32.vlgmr.msra.gmra.mrb[0].mxu0 %vm26_vm1, %v263_v30 }
 0x15a   :  { %v199_v34 = vpop.f32.mrb[0].mxu0 }
 0x15b   :  { %v121_v35 = vadd.f32 %v199_v34, %v48_v32  ;;  %v115_v36 = vpop.f32.mrb[1].mxu0 }
 0x15c   :  { %v116_v37 = vadd.f32 %v115_v36, %v47_v33 }
 0x15d   :  { %126 = vst.msk [vmem:[#allocation2 + $0x8] sm:$0xff] %vm124_vm2, %v121_v35 }
 0x15e   :  { %125 = vst.msk [vmem:[#allocation2] sm:$0xff] %vm124_vm2, %v116_v37 }
 0x15f   :  { %249 = shalt.err (!%p246_p4)
}
 0x160   :  { %s250_s28 = scalar_lea.hbm %s362_s3, 256 }
 0x161   :  { %p251_p5 = scmp.ne.s32.totalorder %s362_s3, %s250_s28  ;;  %p254_p6 = scmp.lt.u32.totalorder %s250_s28, %s362_s3 }
 0x163   :  { %p256_p7 = pnand %p254_p6, %p251_p5 }
 0x165   :  { %259 = shalt.err (!%p256_p7)
}
 0x166   :  { %s265_s4 = smov 128   ;;  %s266_s5 = smov 8  }
 0x167   :  { %138 = dma.vmem_to_hbm [thread:$0]  %s133_s22, 256, %s362_s3, [#allocation3], %s265_s4, %s265_s4, %s266_s5  }
 0x168   :  { %260 = dma.done.wait [#allocation3], 256  }
 0x169   :  { %261 = vsyncadd [#allocation3], 4294967040 }
 0x16a   :  { %142 = vsyncpa [#allocation3], 1 }

</bundles_post_ra>
